<compile_context>
chip_gen: v6e
topology: v6e:2x2x1
jax: 0.10.0
libtpu: 0.0.40
codegen_flags: <defaults>
</compile_context>

<pallas_src>
import functools
import math

import jax
import jax.numpy as jnp
from jax import lax
from jax.experimental import pallas as pl
from jax.experimental.pallas import tpu as pltpu


def _round_up(x, m):
    return (x + m - 1) // m * m


def _siglip_kernel(scale_t_ref, bias_ref, nvalid_ref, src_ref, tgt_t_ref,
                   idc_ref, idr_ref, o_ref, *, has_pad):
    """One (tm, tn) logits tile of the SigLIP loss.

    scale_t_ref : SMEM (1,) f32   exp(scale) (pre-computed in the wrapper)
    bias_ref    : SMEM (1,) f32   bias
    nvalid_ref  : SMEM (1,) i32   true (unpadded) batch size B
    src_ref     : VMEM (tm, Dp)   source rows (resident across the j loop)
    tgt_t_ref   : VMEM (Dp, tn)   transposed target columns (streamed over j)
    idc_ref     : VMEM (tm, 1) i32  sample ids for the row block
    idr_ref     : VMEM (1, tn) i32  sample ids for the col block
    o_ref       : VMEM (8, tn) f32  per-i-block partial loss (lane-dense)
    """
    i = pl.program_id(0)
    j = pl.program_id(1)
    ni = pl.num_programs(0)
    nj = pl.num_programs(1)
    tm = src_ref.shape[0]
    tn = tgt_t_ref.shape[1]

    @pl.when(j == 0)
    def _():
        o_ref[...] = jnp.zeros_like(o_ref)

    # Plain (tm, Dp) @ (Dp, tn) MXU contraction, f32 accumulation.
    logits = jnp.dot(src_ref[...], tgt_t_ref[...],
                     preferred_element_type=jnp.float32)
    logits = logits * scale_t_ref[0] + bias_ref[0]

    # labels are +/-1, so labels * logits is just a sign flip.
    same = idc_ref[...] == idr_ref[...]            # (tm,1)==(1,tn) -> (tm,tn)
    z = jnp.where(same, logits, -logits)
    # numerically stable logsigmoid(z) = min(z, 0) - log1p(exp(-|z|))
    logsig = jnp.minimum(z, 0.0) - jnp.log1p(jnp.exp(-jnp.abs(z)))

    def _accumulate(vals):
        # Sublane-group sum: (tm, tn) -> (tm//8, 8, tn) -> (8, tn).
        # Pure VPU adds, no cross-sublane XLU reduce, unmasked full-tile RMW.
        o_ref[...] += vals.reshape(tm // 8, 8, tn).sum(axis=0)

    if has_pad:
        # Padding (< 128 rows/cols) lives only in the last row / col block.
        edge = (i == ni - 1) | (j == nj - 1)

        @pl.when(edge)
        def _():
            nb = nvalid_ref[0]
            row = i * tm + lax.broadcasted_iota(jnp.int32, (tm, tn), 0)
            col = j * tn + lax.broadcasted_iota(jnp.int32, (tm, tn), 1)
            _accumulate(jnp.where((row < nb) & (col < nb), logsig, 0.0))

        @pl.when(jnp.logical_not(edge))
        def _():
            _accumulate(logsig)
    else:
        _accumulate(logsig)


def _pick_tiles(Bp, Dp, itemsize, budget=24 * 1024 * 1024):
    """Pick (tm, tn) that divide Bp, fit a VMEM budget, and keep ni >= 2."""
    def footprint(tm, tn):
        return (2 * tm * Dp * itemsize        # src (double-buffer bound)
                + 2 * Dp * tn * itemsize      # tgt^T (double-buffered stream)
                + 2 * 8 * tn * 4              # output partials
                + 2 * tm * tn * 4)            # f32 logits / logsig temps

    cands = [c for c in (512, 384, 256, 128) if Bp % c == 0] or [128]
    tn = next((c for c in cands if footprint(128, c) <= budget), 128)
    # Cap tm so that ni >= 2 when Bp allows it (v7x megacore: i is the only
    # parallel axis).
    tm_cap = Bp if Bp <= 128 else max(128, Bp // 2)
    tm = next((c for c in cands if c <= tm_cap and footprint(c, tn) <= budget),
              128)
    return tm, tn


def siglip_loss(source_embeddings, target_embeddings, scale, bias,
                sample_ids=None, *, tm=None, tn=None, compute_dtype=None):
    """Pallas wrapper reproducing SigLIPLoss.forward semantics (single device).

    compute_dtype: optionally cast the streamed embeddings (e.g. jnp.bfloat16
    on v6e/v7x for half the HBM traffic and full MXU rate); accumulation and
    the logsigmoid epilogue always run in f32.
    """
    B, D = source_embeddings.shape
    assert target_embeddings.shape == (B, D)

    if sample_ids is None:
        sample_ids = jnp.arange(B, dtype=jnp.int32)
    sample_ids = jnp.asarray(sample_ids, jnp.int32)

    # Pad B and D only up to 128 (lane width); the whole padded feature dim is
    # contracted in one dot per tile (nk = 1).
    Bp = _round_up(B, 128)
    Dp = _round_up(D, 128)

    src = source_embeddings
    tgt = target_embeddings
    if compute_dtype is not None:
        src = src.astype(compute_dtype)
        tgt = tgt.astype(compute_dtype)
    if (Bp, Dp) != (B, D):
        src = jnp.pad(src, ((0, Bp - B), (0, Dp - D)))
        tgt = jnp.pad(tgt, ((0, Bp - B), (0, Dp - D)))
    # One-time transpose so the kernel never transposes the streamed operand.
    tgt_t = tgt.T

    ids = sample_ids
    if Bp != B:
        ids = jnp.pad(ids, (0, Bp - B), constant_values=-1)
    ids_col = ids.reshape(Bp, 1)
    ids_row = ids.reshape(1, Bp)

    itemsize = jnp.dtype(src.dtype).itemsize
    tm_auto, tn_auto = _pick_tiles(Bp, Dp, itemsize)
    tm = tm_auto if tm is None else tm
    tn = tn_auto if tn is None else tn
    assert Bp % tm == 0 and Bp % tn == 0, (Bp, tm, tn)
    assert tm % 8 == 0 and tn % 128 == 0, (tm, tn)

    ni, nj = Bp // tm, Bp // tn
    has_pad = Bp != B

    scale_t = jnp.exp(jnp.asarray(scale, jnp.float32).reshape(1))  # hoisted exp
    bias_arr = jnp.asarray(bias, jnp.float32).reshape(1)
    nvalid = jnp.array([B], dtype=jnp.int32)

    # VMEM limit derived from the actual tile footprint (portable across
    # 128 MiB v5e/v6e and 64 MiB-per-TC v7x).
    footprint = (2 * tm * Dp * itemsize + 2 * Dp * tn * itemsize
                 + 2 * 8 * tn * 4 + 2 * tm * tn * 4)
    vmem_limit = int(min(max(footprint * 3 // 2 + (2 << 20), 16 << 20),
                         64 << 20))

    cost = pl.CostEstimate(
        flops=2 * Bp * Bp * Dp,
        transcendentals=2 * Bp * Bp,
        bytes_accessed=(1 + ni) * Bp * Dp * itemsize + ni * 8 * tn * 4
                       + 2 * Bp * 4)

    kernel = functools.partial(_siglip_kernel, has_pad=has_pad)

    partials = pl.pallas_call(
        kernel,
        out_shape=jax.ShapeDtypeStruct((ni * 8, tn), jnp.float32),
        grid=(ni, nj),
        in_specs=[
            pl.BlockSpec(memory_space=pltpu.SMEM),          # exp(scale)
            pl.BlockSpec(memory_space=pltpu.SMEM),          # bias
            pl.BlockSpec(memory_space=pltpu.SMEM),          # true batch size
            pl.BlockSpec((tm, Dp), lambda i, j: (i, 0)),    # src (resident in j)
            pl.BlockSpec((Dp, tn), lambda i, j: (0, j)),    # tgt^T (streamed)
            pl.BlockSpec((tm, 1), lambda i, j: (i, 0)),     # ids (rows)
            pl.BlockSpec((1, tn), lambda i, j: (0, j)),     # ids (cols)
        ],
        out_specs=pl.BlockSpec((8, tn), lambda i, j: (i, 0)),
        compiler_params=pltpu.CompilerParams(
            dimension_semantics=("parallel", "arbitrary"),
            vmem_limit_bytes=vmem_limit),
        cost_estimate=cost,
    )(scale_t, bias_arr, nvalid, src, tgt_t, ids_col, ids_row)

    # Final tiny reduction over per-row-block lane partials (cheap XLA work).
    return -jnp.sum(partials) / B


def siglip_loss_ref(source_embeddings, target_embeddings, scale, bias,
                    sample_ids=None):
    """Pure-JAX reference mirroring the PyTorch forward."""
    B = source_embeddings.shape[0]
    logits = jnp.exp(scale[0]) * (source_embeddings.astype(jnp.float32)
                                  @ target_embeddings.astype(jnp.float32).T)
    logits = logits + bias[0]
    if sample_ids is None:
        sample_ids = jnp.arange(B)
    id_mask = (sample_ids[:, None] == sample_ids[None, :]).astype(logits.dtype)
    labels = 2.0 * id_mask - 1.0
    logsig = jax.nn.log_sigmoid(labels * logits)
    return -jnp.sum(logsig) / B


if __name__ == "__main__":
    # Deterministic parameter init, matching SigLIPLoss.__init__
    scale = jnp.array([math.log(10.0)], dtype=jnp.float32)
    bias = jnp.array([-10.0], dtype=jnp.float32)

    key = jax.random.PRNGKey(0)
    k1, k2, k3, k4 = jax.random.split(key, 4)

    # --- small synthetic inputs: batch=8, hidden=32 (single-tile path) ---
    B, D = 8, 32
    src = jax.random.normal(k1, (B, D), dtype=jnp.float32)
    tgt = jax.random.normal(k2, (B, D), dtype=jnp.float32)

    loss = siglip_loss(src, tgt, scale, bias)
    jax.block_until_ready(loss)
    loss_ref = siglip_loss_ref(src, tgt, scale, bias)
    assert jnp.allclose(loss, loss_ref, rtol=1e-5, atol=1e-5), (loss, loss_ref)

    # --- duplicate sample ids (exercises the id-mask path) ---
    ids = jnp.array([0, 1, 2, 3, 0, 1, 2, 3], dtype=jnp.int32)
    loss2 = siglip_loss(src, tgt, scale, bias, sample_ids=ids)
    jax.block_until_ready(loss2)
    loss2_ref = siglip_loss_ref(src, tgt, scale, bias, sample_ids=ids)
    assert jnp.allclose(loss2, loss2_ref, rtol=1e-5, atol=1e-5), (loss2, loss2_ref)

    # --- multi-tile grid with padding (explicit 128 tiles -> ni=nj=2) ---
    B2, D2 = 200, 300
    src2 = jax.random.normal(k3, (B2, D2), dtype=jnp.float32)
    tgt2 = jax.random.normal(k4, (B2, D2), dtype=jnp.float32)
    loss3 = siglip_loss(src2, tgt2, scale, bias, tm=128, tn=128)
    jax.block_until_ready(loss3)
    loss3_ref = siglip_loss_ref(src2, tgt2, scale, bias)
    assert jnp.allclose(loss3, loss3_ref, rtol=1e-4, atol=1e-4), (loss3, loss3_ref)

    # --- same inputs, auto-picked tiles (ni>=2 path, larger tn) ---
    loss3b = siglip_loss(src2, tgt2, scale, bias)
    jax.block_until_ready(loss3b)
    assert jnp.allclose(loss3b, loss3_ref, rtol=1e-4, atol=1e-4), (loss3b, loss3_ref)

    # --- bf16 streamed operands (v6e/v7x fast path); ref on bf16-cast inputs ---
    src2_b = src2.astype(jnp.bfloat16).astype(jnp.float32)
    tgt2_b = tgt2.astype(jnp.bfloat16).astype(jnp.float32)
    loss4 = siglip_loss(src2, tgt2, scale, bias, compute_dtype=jnp.bfloat16)
    jax.block_until_ready(loss4)
    loss4_ref = siglip_loss_ref(src2_b, tgt2_b, scale, bias)
    assert jnp.allclose(loss4, loss4_ref, rtol=5e-3, atol=5e-3), (loss4, loss4_ref)

    print("KERNEL_OK")
</pallas_src>

<mosaic_0001>
module attributes {stable_mosaic.version = 11 : i64} {
  func.func @_siglip_kernel(%arg0: i32, %arg1: i32, %arg2: memref<1xf32, #tpu.memory_space<smem>>, %arg3: memref<1xf32, #tpu.memory_space<smem>>, %arg4: memref<1xi32, #tpu.memory_space<smem>>, %arg5: memref<128x128xf32, #tpu.memory_space<vmem>>, %arg6: memref<128x128xf32, #tpu.memory_space<vmem>>, %arg7: memref<128x1xi32, #tpu.memory_space<vmem>>, %arg8: memref<1x128xi32, #tpu.memory_space<vmem>>, %arg9: memref<8x128xf32, #tpu.memory_space<vmem>>) attributes {dimension_semantics = [#tpu.dimension_semantics<parallel>, #tpu.dimension_semantics<arbitrary>], iteration_bounds = array<i64: 1, 1>, scalar_prefetch = 0 : i64, scratch_operands = 0 : i64, tpu.core_type = #tpu.core_type<tc>, window_params = [{transform_indices = @transform_0, window_bounds = array<i64: 1>}, {transform_indices = @transform_1, window_bounds = array<i64: 1>}, {transform_indices = @transform_2, window_bounds = array<i64: 1>}, {transform_indices = @transform_3, window_bounds = array<i64: 128, 128>}, {transform_indices = @transform_4, window_bounds = array<i64: 128, 128>}, {transform_indices = @transform_5, window_bounds = array<i64: 128, 1>}, {transform_indices = @transform_6, window_bounds = array<i64: 1, 128>}, {transform_indices = @transform_7, window_bounds = array<i64: 8, 128>}]} {
    %c0_i32 = arith.constant 0 : i32
    %0 = arith.cmpi eq, %arg1, %c0_i32 : i32
    %1 = arith.extui %0 : i1 to i32
    %c0_i32_0 = arith.constant 0 : i32
    %2 = arith.cmpi ne, %1, %c0_i32_0 : i32
    scf.if %2 {
      %cst_17 = arith.constant 0.000000e+00 : f32
      %36 = vector.broadcast %cst_17 : f32 to vector<8x128xf32>
      %c0_18 = arith.constant 0 : index
      %c0_19 = arith.constant 0 : index
      %37 = vector.load %arg9[%c0_18, %c0_19] : memref<8x128xf32, #tpu.memory_space<vmem>>, vector<8x128xf32>
      tpu.vector_store %arg9[%c0_18, %c0_19], %36 {strides = array<i32>} : memref<8x128xf32, #tpu.memory_space<vmem>>, vector<8x128xf32>,
    } else {
    }
    %c0 = arith.constant 0 : index
    %c0_1 = arith.constant 0 : index
    %3 = vector.load %arg5[%c0, %c0_1] : memref<128x128xf32, #tpu.memory_space<vmem>>, vector<128x128xf32>
    %c0_2 = arith.constant 0 : index
    %c0_3 = arith.constant 0 : index
    %4 = vector.load %arg6[%c0_2, %c0_3] : memref<128x128xf32, #tpu.memory_space<vmem>>, vector<128x128xf32>
    %cst = arith.constant dense<0.000000e+00> : vector<128x128xf32>
    %5 = tpu.matmul %3, %4, %cst {dimension_numbers = #tpu.dot_dimension_numbers<[1], [0], [0], [1], [0, 0, 1, 1], [], []>} : vector<128x128xf32>, vector<128x128xf32>, vector<128x128xf32> -> vector<128x128xf32>
    %c0_4 = arith.constant 0 : index
    %6 = memref.load %arg2[%c0_4] : memref<1xf32, #tpu.memory_space<smem>>
    %7 = vector.broadcast %6 : f32 to vector<128x128xf32>
    %8 = arith.mulf %5, %7 : vector<128x128xf32>
    %c0_5 = arith.constant 0 : index
    %9 = memref.load %arg3[%c0_5] : memref<1xf32, #tpu.memory_space<smem>>
    %10 = vector.broadcast %9 : f32 to vector<128x128xf32>
    %11 = arith.addf %8, %10 : vector<128x128xf32>
    %c0_6 = arith.constant 0 : index
    %c0_7 = arith.constant 0 : index
    %12 = vector.load %arg7[%c0_6, %c0_7] : memref<128x1xi32, #tpu.memory_space<vmem>>, vector<128x1xi32>
    %c0_8 = arith.constant 0 : index
    %c0_9 = arith.constant 0 : index
    %13 = vector.load %arg8[%c0_8, %c0_9] : memref<1x128xi32, #tpu.memory_space<vmem>>, vector<1x128xi32>
    %14 = vector.broadcast %12 : vector<128x1xi32> to vector<128x128xi32>
    %15 = vector.broadcast %13 : vector<1x128xi32> to vector<128x128xi32>
    %16 = arith.cmpi eq, %14, %15 : vector<128x128xi32>
    %cst_10 = arith.constant 0.000000e+00 : f32
    %17 = vector.broadcast %cst_10 : f32 to vector<128x128xf32>
    %18 = arith.subf %17, %11 : vector<128x128xf32>
    %19 = arith.select %16, %11, %18 : vector<128x128xi1>, vector<128x128xf32>
    %cst_11 = arith.constant 0.000000e+00 : f32
    %20 = vector.broadcast %cst_11 : f32 to vector<128x128xf32>
    %21 = arith.minimumf %19, %20 : vector<128x128xf32>
    %22 = math.absf %19 : vector<128x128xf32>
    %cst_12 = arith.constant 0.000000e+00 : f32
    %23 = vector.broadcast %cst_12 : f32 to vector<128x128xf32>
    %24 = arith.subf %23, %22 : vector<128x128xf32>
    %25 = math.exp %24 : vector<128x128xf32>
    %26 = math.log1p %25 : vector<128x128xf32>
    %27 = arith.subf %21, %26 : vector<128x128xf32>
    %c0_i32_13 = arith.constant 0 : i32
    %28 = arith.cmpi eq, %arg0, %c0_i32_13 : i32
    %c0_i32_14 = arith.constant 0 : i32
    %29 = arith.cmpi eq, %arg1, %c0_i32_14 : i32
    %30 = arith.ori %28, %29 : i1
    %31 = arith.extui %30 : i1 to i32
    %c0_i32_15 = arith.constant 0 : i32
    %32 = arith.cmpi ne, %31, %c0_i32_15 : i32
    scf.if %32 {
      %c0_17 = arith.constant 0 : index
      %36 = memref.load %arg4[%c0_17] : memref<1xi32, #tpu.memory_space<smem>>
      %c128_i32 = arith.constant 128 : i32
      %37 = arith.muli %arg0, %c128_i32 : i32
      %38 = tpu.iota {dimensions = array<i32: 0>} : vector<128x128xi32>
      %39 = vector.broadcast %37 : i32 to vector<128x128xi32>
      %40 = arith.addi %39, %38 : vector<128x128xi32>
      %c128_i32_18 = arith.constant 128 : i32
      %41 = arith.muli %arg1, %c128_i32_18 : i32
      %42 = tpu.iota {dimensions = array<i32: 1>} : vector<128x128xi32>
      %43 = vector.broadcast %41 : i32 to vector<128x128xi32>
      %44 = arith.addi %43, %42 : vector<128x128xi32>
      %45 = vector.broadcast %36 : i32 to vector<128x128xi32>
      %46 = arith.cmpi slt, %40, %45 : vector<128x128xi32>
      %47 = vector.broadcast %36 : i32 to vector<128x128xi32>
      %48 = arith.cmpi slt, %44, %47 : vector<128x128xi32>
      %49 = arith.andi %46, %48 : vector<128x128xi1>
      %cst_19 = arith.constant 0.000000e+00 : f32
      %50 = vector.broadcast %cst_19 : f32 to vector<128x128xf32>
      %51 = arith.select %49, %27, %50 : vector<128x128xi1>, vector<128x128xf32>
      %c0_20 = arith.constant 0 : index
      %c0_21 = arith.constant 0 : index
      %52 = vector.load %arg9[%c0_20, %c0_21] : memref<8x128xf32, #tpu.memory_space<vmem>>, vector<8x128xf32>
      %53 = vector.shape_cast %51 : vector<128x128xf32> to vector<16x8x128xf32>
      %cst_22 = arith.constant dense<0.000000e+00> : vector<8x128xf32>
      %54 = vector.multi_reduction <add>, %53, %cst_22 [0] : vector<16x8x128xf32> to vector<8x128xf32>
      %55 = arith.addf %52, %54 : vector<8x128xf32>
      %c0_23 = arith.constant 0 : index
      %c0_24 = arith.constant 0 : index
      %56 = vector.load %arg9[%c0_23, %c0_24] : memref<8x128xf32, #tpu.memory_space<vmem>>, vector<8x128xf32>
      tpu.vector_store %arg9[%c0_23, %c0_24], %55 {strides = array<i32>} : memref<8x128xf32, #tpu.memory_space<vmem>>, vector<8x128xf32>,
    } else {
    }
    %true = arith.constant true
    %33 = arith.xori %30, %true : i1
    %34 = arith.extui %33 : i1 to i32
    %c0_i32_16 = arith.constant 0 : i32
    %35 = arith.cmpi ne, %34, %c0_i32_16 : i32
    scf.if %35 {
      %c0_17 = arith.constant 0 : index
      %c0_18 = arith.constant 0 : index
      %36 = vector.load %arg9[%c0_17, %c0_18] : memref<8x128xf32, #tpu.memory_space<vmem>>, vector<8x128xf32>
      %37 = vector.shape_cast %27 : vector<128x128xf32> to vector<16x8x128xf32>
      %cst_19 = arith.constant dense<0.000000e+00> : vector<8x128xf32>
      %38 = vector.multi_reduction <add>, %37, %cst_19 [0] : vector<16x8x128xf32> to vector<8x128xf32>
      %39 = arith.addf %36, %38 : vector<8x128xf32>
      %c0_20 = arith.constant 0 : index
      %c0_21 = arith.constant 0 : index
      %40 = vector.load %arg9[%c0_20, %c0_21] : memref<8x128xf32, #tpu.memory_space<vmem>>, vector<8x128xf32>
      tpu.vector_store %arg9[%c0_20, %c0_21], %39 {strides = array<i32>} : memref<8x128xf32, #tpu.memory_space<vmem>>, vector<8x128xf32>,
    } else {
    }
    return
  }
  func.func @transform_0(%arg0: i32, %arg1: i32) -> i32 {
    %c0_i32 = arith.constant 0 : i32
    %c0_i32_0 = arith.constant 0 : i32
    return %c0_i32 : i32
  }
  func.func @transform_1(%arg0: i32, %arg1: i32) -> i32 {
    %c0_i32 = arith.constant 0 : i32
    %c0_i32_0 = arith.constant 0 : i32
    return %c0_i32 : i32
  }
  func.func @transform_2(%arg0: i32, %arg1: i32) -> i32 {
    %c0_i32 = arith.constant 0 : i32
    %c0_i32_0 = arith.constant 0 : i32
    return %c0_i32 : i32
  }
  func.func @transform_3(%arg0: i32, %arg1: i32) -> (i32, i32) {
    %c0_i32 = arith.constant 0 : i32
    %c0_i32_0 = arith.constant 0 : i32
    return %arg0, %c0_i32 : i32, i32
  }
  func.func @transform_4(%arg0: i32, %arg1: i32) -> (i32, i32) {
    %c0_i32 = arith.constant 0 : i32
    %c0_i32_0 = arith.constant 0 : i32
    return %c0_i32, %arg1 : i32, i32
  }
  func.func @transform_5(%arg0: i32, %arg1: i32) -> (i32, i32) {
    %c0_i32 = arith.constant 0 : i32
    %c0_i32_0 = arith.constant 0 : i32
    return %arg0, %c0_i32 : i32, i32
  }
  func.func @transform_6(%arg0: i32, %arg1: i32) -> (i32, i32) {
    %c0_i32 = arith.constant 0 : i32
    %c0_i32_0 = arith.constant 0 : i32
    return %c0_i32, %arg1 : i32, i32
  }
  func.func @transform_7(%arg0: i32, %arg1: i32) -> (i32, i32) {
    %c0_i32 = arith.constant 0 : i32
    %c0_i32_0 = arith.constant 0 : i32
    return %arg0, %c0_i32 : i32, i32
  }
}

</mosaic_0001>

<bundles_post_ra>
// kernel: tpu_custom_call.1
= control target key start
LH: loop header
LB: loop body
LE: loop exit
PB: predicated region body
PF: predicated region fallthrough
CT: control target
= control target key end

     0   :  { %15 = vsyncpa [#allocation6], 0  ;;  %s1744_s0 = inlined_call_operand.<no memory space> [shape: f32[1], index: 0, kind: input, shape index: {}]   ;;  %s1745_s1 = inlined_call_operand.<no memory space> [shape: f32[1], index: 1, kind: input, shape index: {}]   ;;  %s1746_s2 = inlined_call_operand.<no memory space> [shape: s32[1], index: 2, kind: input, shape index: {}]   ;;  %s1747_s3 = inlined_call_operand.vmem [shape: f32[128,128], index: 3, kind: input, shape index: {}]   ;;  %s1748_s4 = inlined_call_operand.hbm [shape: f32[128,128], index: 4, kind: input, shape index: {}]   ;;  %s1749_s5 = inlined_call_operand.vmem [shape: s32[128,1], index: 5, kind: input, shape index: {}]   ;;  %s1750_s6 = inlined_call_operand.vmem [shape: s32[1,128], index: 6, kind: input, shape index: {}]   ;;  %s1751_s7 = inlined_call_operand.hbm [shape: f32[8,128], index: 7, kind: output, shape index: {}]  }
   0x1   :  { %16 = vsyncpa [#allocation7], 0  ;;  %s1006_s24 = smov [#allocation5]  }
   0x2   :  { %s30_s25 = sshll.u32 %s1006_s24, 4  ;;  %s31_s25 = int_to_ptr.vmem [resolvable:$true] %s30_s25 }
   0x3   :  { %s970_s26 = scalar_lea.vmem %s31_s25, 2048  ;;  %p975_p1 = scmp.lt.s32.totalorder %s31_s25, %s31_s25 }
   0x4   :  { %p971_p0 = scmp.ne.s32.totalorder %s31_s25, %s970_s26  ;;  %p976_p2 = scmp.lt.s32.totalorder %s970_s26, %s970_s26 }
   0x6   :  { %p977_p3 = por %p976_p2, %p975_p1 }
   0x8   :  { %p978_p4 = pnand %p977_p3, %p971_p0 }
   0xa   :  { %981 = shalt.err (!%p978_p4)
}
   0xb   :  { %s1007_s27 = smov 128   ;;  %s1008_s28 = smov 8  }
   0xc   :  { %36 = dma.hbm_to_vmem [thread:$0]  %s1748_s4, 2048, %s31_s25, [#allocation6], %s1007_s27, %s1007_s27, %s1008_s28  }
   0xd   :  { %1002 = dma.done.wait [#allocation6], 2048  }
   0xe   :  { %1003 = vsyncadd [#allocation6], 4294965248  ;;  %v1009_v0 = vmov 0   ;;  %v80_v1 = vld [vmem:[#allocation5 + $0x78] sm:$0xff]  ;;  %v79_v2 = vld [vmem:[#allocation5 + $0x70] sm:$0xff]  ;;  %v1153_v52 = vstv %s1744_s0  ;;  %v1159_v56 = vstv %s1745_s1 }
   0xf   :  { %896 = vset.pattern.permute.xlu0 %v1009_v0  ;;  %897 = vset.pattern.permute.xlu1 %v1009_v0  ;;  %v78_v3 = vld [vmem:[#allocation5 + $0x68] sm:$0xff]  ;;  %v77_v4 = vld [vmem:[#allocation5 + $0x60] sm:$0xff]  ;;  %v76_v5 = vld [vmem:[#allocation5 + $0x58] sm:$0xff] }
  0x10   :  { %802 = vmatprep.subr.mxu0 %v80_v1  ;;  %858 = vmatprep.subr.mxu1 %v80_v1  ;;  %v75_v6 = vld [vmem:[#allocation5 + $0x50] sm:$0xff]  ;;  %v74_v7 = vld [vmem:[#allocation5 + $0x48] sm:$0xff]  ;;  %v73_v8 = vld [vmem:[#allocation5 + $0x40] sm:$0xff] }
  0x11   :  { %803 = vmatpush3.msra.mxu0 %v80_v1  ;;  %874 = vmatpush3.msra.mxu1 %v80_v1  ;;  %v72_v9 = vld [vmem:[#allocation5 + $0x38] sm:$0xff]  ;;  %v71_v10 = vld [vmem:[#allocation5 + $0x30] sm:$0xff]  ;;  %v70_v11 = vld [vmem:[#allocation5 + $0x28] sm:$0xff] }
  0x12   :  { %804 = vmatprep.subr.mxu0 %v79_v2  ;;  %859 = vmatprep.subr.mxu1 %v79_v2  ;;  %v69_v12 = vld [vmem:[#allocation5 + $0x20] sm:$0xff]  ;;  %v68_v13 = vld [vmem:[#allocation5 + $0x18] sm:$0xff]  ;;  %v67_v14 = vld [vmem:[#allocation5 + $0x10] sm:$0xff] }
  0x13   :  { %805 = vmatpush3.msra.mxu0 %v79_v2  ;;  %875 = vmatpush3.msra.mxu1 %v79_v2  ;;  %v66_v15 = vld [vmem:[#allocation5 + $0x8] sm:$0xff]  ;;  %v65_v16 = vld [vmem:[#allocation5] sm:$0xff]  ;;  %v51_v21 = vld [vmem:[%s1747_s3 + $0x10] sm:$0xff] }
  0x14   :  { %806 = vmatprep.subr.mxu0 %v78_v3  ;;  %860 = vmatprep.subr.mxu1 %v78_v3  ;;  %v49_v17 = vld [vmem:[%s1747_s3] sm:$0xff]  ;;  %v50_v19 = vld [vmem:[%s1747_s3 + $0x8] sm:$0xff]  ;;  %v59_v22 = vld [vmem:[%s1747_s3 + $0x50] sm:$0xff] }
  0x15   :  { %807 = vmatpush3.msra.mxu0 %v78_v3  ;;  %876 = vmatpush3.msra.mxu1 %v78_v3  ;;  %v57_v18 = vld [vmem:[%s1747_s3 + $0x40] sm:$0xff]  ;;  %v58_v20 = vld [vmem:[%s1747_s3 + $0x48] sm:$0xff]  ;;  %v264_v24 = vld [vmem:[%s1749_s5 + $0x10] sm:$0xff] }
  0x16   :  { %808 = vmatprep.subr.mxu0 %v77_v4  ;;  %861 = vmatprep.subr.mxu1 %v77_v4  ;;  %v262_v23 = vld [vmem:[%s1749_s5] sm:$0xff]  ;;  %v52_v25 = vld [vmem:[%s1747_s3 + $0x18] sm:$0xff]  ;;  %v263_v29 = vld [vmem:[%s1749_s5 + $0x8] sm:$0xff] }
  0x17   :  { %809 = vmatpush3.msra.mxu0 %v77_v4  ;;  %877 = vmatpush3.msra.mxu1 %v77_v4  ;;  %v60_v26 = vld [vmem:[%s1747_s3 + $0x58] sm:$0xff]  ;;  %v53_v27 = vld [vmem:[%s1747_s3 + $0x20] sm:$0xff]  ;;  %v54_v31 = vld [vmem:[%s1747_s3 + $0x28] sm:$0xff] }
  0x18   :  { %810 = vmatprep.subr.mxu0 %v76_v5  ;;  %862 = vmatprep.subr.mxu1 %v76_v5  ;;  %v61_v28 = vld [vmem:[%s1747_s3 + $0x60] sm:$0xff]  ;;  %v265_v30 = vld [vmem:[%s1749_s5 + $0x18] sm:$0xff]  ;;  %v62_v32 = vld [vmem:[%s1747_s3 + $0x68] sm:$0xff] }
  0x19   :  { %811 = vmatpush3.msra.mxu0 %v76_v5  ;;  %878 = vmatpush3.msra.mxu1 %v76_v5  ;;  %v55_v33 = vld [vmem:[%s1747_s3 + $0x30] sm:$0xff]  ;;  %v266_v35 = vld [vmem:[%s1749_s5 + $0x20] sm:$0xff]  ;;  %v267_v36 = vld [vmem:[%s1749_s5 + $0x28] sm:$0xff] }
  0x1a   :  { %812 = vmatprep.subr.mxu0 %v75_v6  ;;  %863 = vmatprep.subr.mxu1 %v75_v6  ;;  %v63_v34 = vld [vmem:[%s1747_s3 + $0x70] sm:$0xff]  ;;  %v56_v37 = vld [vmem:[%s1747_s3 + $0x38] sm:$0xff]  ;;  %v270_v41 = vld [vmem:[%s1749_s5 + $0x40] sm:$0xff] }
  0x1b   :  { %813 = vmatpush3.msra.mxu0 %v75_v6  ;;  %879 = vmatpush3.msra.mxu1 %v75_v6  ;;  %v64_v38 = vld [vmem:[%s1747_s3 + $0x78] sm:$0xff]  ;;  %v268_v39 = vld [vmem:[%s1749_s5 + $0x30] sm:$0xff]  ;;  %v271_v42 = vld [vmem:[%s1749_s5 + $0x48] sm:$0xff] }
  0x1c   :  { %814 = vmatprep.subr.mxu0 %v74_v7  ;;  %864 = vmatprep.subr.mxu1 %v74_v7  ;;  %v269_v40 = vld [vmem:[%s1749_s5 + $0x38] sm:$0xff]  ;;  %v272_v43 = vld [vmem:[%s1749_s5 + $0x50] sm:$0xff]  ;;  %v274_v45 = vld [vmem:[%s1749_s5 + $0x60] sm:$0xff] }
  0x1d   :  { %815 = vmatpush3.msra.mxu0 %v74_v7  ;;  %880 = vmatpush3.msra.mxu1 %v74_v7  ;;  %v273_v44 = vld [vmem:[%s1749_s5 + $0x58] sm:$0xff]  ;;  %v275_v46 = vld [vmem:[%s1749_s5 + $0x68] sm:$0xff]  ;;  %v276_v47 = vld [vmem:[%s1749_s5 + $0x70] sm:$0xff] }
  0x1e   :  { %816 = vmatprep.subr.mxu0 %v73_v8  ;;  %865 = vmatprep.subr.mxu1 %v73_v8  ;;  %v277_v48 = vld [vmem:[%s1749_s5 + $0x78] sm:$0xff]  ;;  %v1168_v63 = vld [vmem:[%s1750_s6] ss:$0 sm:$0xff] }
  0x1f   :  { %817 = vmatpush3.msra.mxu0 %v73_v8  ;;  %881 = vmatpush3.msra.mxu1 %v73_v8 }
  0x20   :  { %818 = vmatprep.subr.mxu0 %v72_v9  ;;  %866 = vmatprep.subr.mxu1 %v72_v9 }
  0x21   :  { %819 = vmatpush3.msra.mxu0 %v72_v9  ;;  %882 = vmatpush3.msra.mxu1 %v72_v9 }
  0x22   :  { %820 = vmatprep.subr.mxu0 %v71_v10  ;;  %867 = vmatprep.subr.mxu1 %v71_v10 }
  0x23   :  { %821 = vmatpush3.msra.mxu0 %v71_v10  ;;  %883 = vmatpush3.msra.mxu1 %v71_v10 }
  0x24   :  { %822 = vmatprep.subr.mxu0 %v70_v11  ;;  %868 = vmatprep.subr.mxu1 %v70_v11 }
  0x25   :  { %823 = vmatpush3.msra.mxu0 %v70_v11  ;;  %884 = vmatpush3.msra.mxu1 %v70_v11 }
  0x26   :  { %824 = vmatprep.subr.mxu0 %v69_v12  ;;  %869 = vmatprep.subr.mxu1 %v69_v12 }
  0x27   :  { %825 = vmatpush3.msra.mxu0 %v69_v12  ;;  %885 = vmatpush3.msra.mxu1 %v69_v12 }
  0x28   :  { %826 = vmatprep.subr.mxu0 %v68_v13  ;;  %870 = vmatprep.subr.mxu1 %v68_v13 }
  0x29   :  { %827 = vmatpush3.msra.mxu0 %v68_v13  ;;  %886 = vmatpush3.msra.mxu1 %v68_v13 }
  0x2a   :  { %828 = vmatprep.subr.mxu0 %v67_v14  ;;  %871 = vmatprep.subr.mxu1 %v67_v14 }
  0x2b   :  { %829 = vmatpush3.msra.mxu0 %v67_v14  ;;  %887 = vmatpush3.msra.mxu1 %v67_v14 }
  0x2c   :  { %830 = vmatprep.subr.mxu0 %v66_v15  ;;  %872 = vmatprep.subr.mxu1 %v66_v15 }
  0x2d   :  { %831 = vmatpush3.msra.mxu0 %v66_v15  ;;  %888 = vmatpush3.msra.mxu1 %v66_v15 }
  0x2e   :  { %832 = vmatprep.subr.mxu0 %v65_v16  ;;  %873 = vmatprep.subr.mxu1 %v65_v16 }
  0x2f   :  { %833 = vmatpush3.msra.mxu0 %v65_v16  ;;  %889 = vmatpush3.msra.mxu1 %v65_v16 }
  0x30   :  { %834 = vmatprep.mubr.f32.mxu0 %v49_v17  ;;  %846 = vmatprep.mubr.f32.mxu1 %v57_v18 }
  0x31   :  { %835 = vmatmul.mubr.f32.vlgmr.msra.gmra.mxu0 %v50_v19  ;;  %847 = vmatmul.mubr.f32.vlgmr.msra.gmra.mxu1 %v58_v20 }
  0x32   :  { %837 = vmatprep.mubr.f32.mxu0 %v51_v21  ;;  %849 = vmatprep.mubr.f32.mxu1 %v59_v22 }
  0x33   :  { %280 = vperm.xlu0 %896, %v262_v23   ;;  %286 = vperm.xlu1 %897, %v264_v24  }
  0x35   :  { %838 = vmatmul.mubr.f32.gmra.mxu0 %v52_v25  ;;  %850 = vmatmul.mubr.f32.gmra.mxu1 %v60_v26 }
  0x36   :  { %840 = vmatprep.mubr.f32.mxu0 %v53_v27  ;;  %852 = vmatprep.mubr.f32.mxu1 %v61_v28 }
  0x37   :  { %283 = vperm.xlu0 %896, %v263_v29   ;;  %289 = vperm.xlu1 %897, %v265_v30  }
  0x39   :  { %841 = vmatmul.mubr.f32.gmra.mxu0 %v54_v31  ;;  %853 = vmatmul.mubr.f32.gmra.mxu1 %v62_v32 }
  0x3a   :  { %843 = vmatprep.mubr.f32.mxu0 %v55_v33  ;;  %855 = vmatprep.mubr.f32.mxu1 %v63_v34 }
  0x3b   :  { %292 = vperm.xlu0 %896, %v266_v35   ;;  %295 = vperm.xlu1 %897, %v267_v36  }
  0x3d   :  { %844 = vmatmul.mubr.f32.gmra.mxu0 %v56_v37  ;;  %856 = vmatmul.mubr.f32.gmra.mxu1 %v64_v38 }
  0x3f   :  { %298 = vperm.xlu0 %896, %v268_v39   ;;  %301 = vperm.xlu1 %897, %v269_v40  }
  0x43   :  { %304 = vperm.xlu0 %896, %v270_v41   ;;  %307 = vperm.xlu1 %897, %v271_v42  }
  0x47   :  { %310 = vperm.xlu0 %896, %v272_v43   ;;  %313 = vperm.xlu1 %897, %v273_v44  }
  0x4b   :  { %316 = vperm.xlu0 %896, %v274_v45   ;;  %319 = vperm.xlu1 %897, %v275_v46  }
  0x4f   :  { %322 = vperm.xlu0 %896, %v276_v47   ;;  %325 = vperm.xlu1 %897, %v277_v48  }
  0xae   :  { %v287_v55 = vpop.permute.xlu1 %286  ;;  %v281_v58 = vpop.permute.xlu0 %280 }
  0xaf   :  { %vm331_vm1 = vcmp.eq.s32.totalorder %v281_v58, %v1168_v63  ;;  %vm333_vm2 = vcmp.eq.s32.totalorder %v287_v55, %v1168_v63 }
  0xb2   :  { %v290_v1 = vpop.permute.xlu1 %289  ;;  %v284_v2 = vpop.permute.xlu0 %283 }
  0xb3   :  { %vm332_vm0 = vcmp.eq.s32.totalorder %v284_v2, %v1168_v63  ;;  %vm334_vm3 = vcmp.eq.s32.totalorder %v290_v1, %v1168_v63 }
  0xb6   :  { %v296_v11 = vpop.permute.xlu1 %295  ;;  %v293_v19 = vpop.permute.xlu0 %292 }
  0xb7   :  { %vm335_vm4 = vcmp.eq.s32.totalorder %v293_v19, %v1168_v63  ;;  %vm336_vm6 = vcmp.eq.s32.totalorder %v296_v11, %v1168_v63 }
  0xba   :  { %v302_v25 = vpop.permute.xlu1 %301  ;;  %v1196_v36 = vpop.permute.xlu0 %298 }
  0xbb   :  { %vm338_vm8 = vcmp.eq.s32.totalorder %v302_v25, %v1168_v63  ;;  %vm337_vm13 = vcmp.eq.s32.totalorder %v1196_v36, %v1168_v63 }
  0xbe   :  { %v308_v43 = vpop.permute.xlu1 %307  ;;  %v305_v55 = vpop.permute.xlu0 %304 }
  0xbf   :  { %vm340_vm5 = vcmp.eq.s32.totalorder %v308_v43, %v1168_v63  ;;  %vm339_vm7 = vcmp.eq.s32.totalorder %v305_v55, %v1168_v63 }
  0xc2   :  { %v314_v11 = vpop.permute.xlu1 %313 }
  0xc3   :  { %vm342_vm10 = vcmp.eq.s32.totalorder %v314_v11, %v1168_v63 }
  0xf1   :  { %v836_v49 = vpop.f32.mrf.mxu0  ;;  %v848_v5 = vpop.f32.mrf.mxu1 }
  0xf2   :  { %v229_v54 = vmul.f32 %v836_v49, %v1153_v52  ;;  %v237_v24 = vmul.f32 %v848_v5, %v1153_v52 }
  0xf3   :  { %v147_v50 = vpop.f32.mrf.mxu0  ;;  %v187_v13 = vpop.f32.mrf.mxu1 }
  0xf4   :  { %v228_v57 = vmul.f32 %v1153_v52, %v147_v50  ;;  %v247_v60 = vadd.f32 %v1159_v56, %v229_v54  ;;  %v236_v27 = vmul.f32 %v1153_v52, %v187_v13  ;;  %v255_v35 = vadd.f32 %v1159_v56, %v237_v24 }
  0xf5   :  { %v839_v51 = vpop.f32.mrf.mxu0  ;;  %v851_v21 = vpop.f32.mrf.mxu1 }
  0xf6   :  { %v246_v62 = vadd.f32 %v1159_v56, %v228_v57  ;;  %v348_v3 = vsub.f32 0.0, %v247_v60  ;;  %v231_v7 = vmul.f32 %v839_v51, %v1153_v52  ;;  %v254_v38 = vadd.f32 %v1159_v56, %v236_v27 }
  0xf7   :  { %v157_v53 = vpop.f32.mrf.mxu0  ;;  %v197_v33 = vpop.f32.mrf.mxu1  ;;  %v356_v47 = vsub.f32 0.0, %v255_v35 }
  0xf8   :  { %v230_v59 = vmul.f32 %v1153_v52, %v157_v53  ;;  %v347_v6 = vsub.f32 0.0, %v246_v62  ;;  %v1175_v10 = vsel %vm332_vm0, %v247_v60, %v348_v3  ;;  %v249_v14 = vadd.f32 %v1159_v56, %v231_v7 }
  0xf9   :  { %v842_v61 = vpop.f32.mrf.mxu0  ;;  %v396_v16 = vand.u32 2147483647, %v1175_v10  ;;  %v854_v46 = vpop.f32.mrf.mxu1  ;;  %v355_v49 = vsub.f32 0.0, %v254_v38  ;;  %v238_v50 = vmul.f32 %v1153_v52, %v197_v33  ;;  %v626_v53 = vlaneseq }
  0xfa   :  { %v248_v0 = vadd.f32 %v1159_v56, %v230_v59  ;;  %v1178_v12 = vsel %vm331_vm1, %v246_v62, %v347_v6  ;;  %v350_v20 = vsub.f32 0.0, %v249_v14  ;;  %v233_v23 = vmul.f32 %v842_v61, %v1153_v52 }
  0xfb   :  { %v167_v4 = vpop.f32.mrf.mxu0  ;;  %v395_v18 = vand.u32 2147483647, %v1178_v12  ;;  %v412_v26 = vsub.f32 0.0, %v396_v16  ;;  %v207_v58 = vpop.f32.mrf.mxu1  ;;  %v1213_v59 = vsel %vm340_vm5, %v255_v35, %v356_v47  ;;  %v239_v60 = vmul.f32 %v851_v21, %v1153_v52 }
  0xfc   :  { %v349_v8 = vsub.f32 0.0, %v248_v0  ;;  %v232_v9 = vmul.f32 %v1153_v52, %v167_v4  ;;  %v1191_v31 = vsel %vm334_vm3, %v249_v14, %v350_v20  ;;  %v251_v34 = vadd.f32 %v1159_v56, %v233_v23 }
  0xfd   :  { %v411_v29 = vsub.f32 0.0, %v395_v18  ;;  %v845_v30 = vpop.f32.mrf.mxu0  ;;  %v429_v37 = vmul.f32 1.442695, %v412_v26  ;;  %v398_v42 = vand.u32 2147483647, %v1191_v31  ;;  %v1216_v62 = vsel %vm339_vm7, %v254_v38, %v355_v49  ;;  %v857_v21 = vpop.f32.mrf.mxu1 }
  0xfe   :  { %v1181_v15 = vsel %vm333_vm2, %v248_v0, %v349_v8  ;;  %v250_v17 = vadd.f32 %v1159_v56, %v232_v9  ;;  %v235_v40 = vmul.f32 %v845_v30, %v1153_v52  ;;  %v352_v45 = vsub.f32 0.0, %v251_v34 }
  0xff   :  { %v397_v22 = vand.u32 2147483647, %v1181_v15  ;;  %v427_v41 = vmul.f32 1.442695, %v411_v29  ;;  %898 = vpow2.f32 %v429_v37  ;;  %v414_v54 = vsub.f32 0.0, %v398_v42 }
 0x100   :  { %v351_v28 = vsub.f32 0.0, %v250_v17  ;;  %v253_v51 = vadd.f32 %v1159_v56, %v235_v40  ;;  %v1208_v57 = vsel %vm336_vm6, %v251_v34, %v352_v45  ;;  %v256_v0 = vadd.f32 %v1159_v56, %v238_v50 }
 0x101   :  { %v413_v32 = vsub.f32 0.0, %v397_v22  ;;  %900 = vpow2.f32 %v427_v41  ;;  %v1219_v2 = vshrl.u32 %v626_v53, 7  ;;  %v433_v3 = vmul.f32 1.442695, %v414_v54 }
 0x102   :  { %v1199_v39 = vsel %vm335_vm4, %v250_v17, %v351_v28  ;;  %v354_v1 = vsub.f32 0.0, %v253_v51  ;;  %v400_v4 = vand.u32 2147483647, %v1208_v57  ;;  %v240_v5 = vmul.f32 %v1153_v52, %v207_v58  ;;  %v311_v17 = vpop.permute.xlu0 %310  ;;  %v177_v28 = vpop.f32.mrf.mxu0 }
 0x103   :  { %v431_v44 = vmul.f32 1.442695, %v413_v32  ;;  %v399_v48 = vand.u32 2147483647, %v1199_v39  ;;  %v404_v6 = vand.u32 2147483647, %v1213_v59  ;;  %v257_v8 = vadd.f32 %v1159_v56, %v239_v60 }
 0x104   :  { %v403_v7 = vand.u32 2147483647, %v1216_v62  ;;  %v357_v13 = vsub.f32 0.0, %v256_v0  ;;  %v241_v14 = vmul.f32 %v854_v46, %v1153_v52  ;;  %v1228_v16 = vsel %vm338_vm8, %v253_v51, %v354_v1 }
 0x105   :  { %902 = vpow2.f32 %v431_v44  ;;  %v415_v61 = vsub.f32 0.0, %v399_v48  ;;  %v1231_v18 = vadd.s32 8, %v1219_v2  ;;  %v416_v19 = vsub.f32 0.0, %v400_v4  ;;  %v320_v44 = vpop.permute.xlu1 %319 }
 0x106   :  { %904 = vpow2.f32 %v433_v3  ;;  %v258_v20 = vadd.f32 %v1159_v56, %v240_v5  ;;  %vm341_vm9 = vcmp.eq.s32.totalorder %v311_v17, %v1168_v63  ;;  %v1235_v22 = vand.u32 127, %v626_v53  ;;  %v317_v47 = vpop.permute.xlu0 %316 }
 0x107   :  { %v435_v9 = vmul.f32 1.442695, %v415_v61  ;;  %v1240_v23 = vstv %s1746_s2  ;;  %v420_v24 = vsub.f32 0.0, %v404_v6  ;;  %v419_v25 = vsub.f32 0.0, %v403_v7  ;;  %s1010_s2 = smov [#allocation8]  }
 0x108   :  { %v358_v26 = vsub.f32 0.0, %v257_v8  ;;  %v402_v27 = vand.u32 2147483647, %v1228_v16  ;;  %v1244_v29 = vsel %vm341_vm9, %v256_v0, %v357_v13  ;;  %v259_v30 = vadd.f32 %v1159_v56, %v241_v14  ;;  %s760_s26 = sshll.u32 %s1010_s2, 4  ;;  %s761_s26 = int_to_ptr.vmem [resolvable:$true] %s760_s26 }
 0x109   :  { %906 = vpow2.f32 %v435_v9  ;;  %v243_v32 = vmul.f32 %v857_v21, %v1153_v52  ;;  %v1251_v34 = vadd.s32 72, %v1219_v2  ;;  %v1254_v35 = vadd.s32 64, %v1219_v2  ;;  %v326_v7 = vpop.permute.xlu1 %325  ;;  %s982_s27 = scalar_lea.vmem %s761_s26, 128  ;;  %p987_p6 = scmp.lt.s32.totalorder %s761_s26, %s761_s26 }
 0x10a   :  { %v437_v37 = vmul.f32 1.442695, %v416_v19  ;;  %v359_v38 = vsub.f32 0.0, %v258_v20  ;;  %v445_v41 = vmul.f32 1.442695, %v420_v24  ;;  %v1259_v42 = vadd.s32 24, %v1219_v2  ;;  %v1301_v21 = vpop.permute.xlu0 %322  ;;  %p983_p5 = scmp.ne.s32.totalorder %s761_s26, %s982_s27  ;;  %p988_p7 = scmp.lt.s32.totalorder %s982_s27, %s982_s27 }
 0x10b   :  { %v1262_v43 = vadd.s32 88, %v1219_v2  ;;  %v234_v45 = vmul.f32 %v1153_v52, %v177_v28  ;;  %v443_v48 = vmul.f32 1.442695, %v419_v25  ;;  %v1269_v49 = vsel %vm342_vm10, %v257_v8, %v358_v26 }
 0x10c   :  { %v1248_v33 = vpop.eup %898  ;;  %v405_v50 = vand.u32 2147483647, %v1244_v29  ;;  %v418_v51 = vsub.f32 0.0, %v402_v27  ;;  %vm343_vm11 = vcmp.eq.s32.totalorder %v317_v47, %v1168_v63  ;;  %v360_v54 = vsub.f32 0.0, %v259_v30  ;;  %p989_p8 = por %p988_p7, %p987_p6 }
 0x10d   :  { %v468_v53 = vadd.f32 1.0, %v1248_v33  ;;  %v261_v55 = vadd.f32 %v1159_v56, %v243_v32  ;;  %v1277_v60 = vadd.s32 16, %v1219_v2  ;;  %908 = vpow2.f32 %v437_v37 }
 0x10e   :  { %v1256_v40 = vpop.eup %900  ;;  %v1279_v61 = vsel %vm343_vm11, %v258_v20, %v359_v38  ;;  %910 = vpow2.f32 %v445_v41  ;;  %v406_v0 = vand.u32 2147483647, %v1269_v49  ;;  %v252_v3 = vadd.f32 %v1159_v56, %v234_v45  ;;  %p990_p9 = pnand %p989_p8, %p983_p5 }
 0x10f   :  { %v459_v58 = vadd.f32 1.0, %v1256_v40  ;;  %912 = vpow2.f32 %v443_v48  ;;  %vm344_vm12 = vcmp.eq.s32.totalorder %v320_v44, %v1168_v63  ;;  %v421_v4 = vsub.f32 0.0, %v405_v50  ;;  %v217_v44 = vpop.f32.mrf.mxu1 }
 0x110   :  { %v441_v5 = vmul.f32 1.442695, %v418_v51  ;;  %914 = vlog2.f32 %v468_v53  ;;  %v1285_v6 = vsel %vm344_vm12, %v259_v30, %v360_v54  ;;  %v407_v8 = vand.u32 2147483647, %v1279_v61 }
 0x111   :  { %v362_v9 = vsub.f32 0.0, %v261_v55  ;;  %916 = vlog2.f32 %v459_v58  ;;  %v1289_v11 = vadd.s32 80, %v1219_v2  ;;  %v1292_v13 = vadd.s32 40, %v1219_v2 }
 0x112   :  { %v1265_v46 = vpop.eup %902  ;;  %v1295_v14 = vadd.s32 104, %v1219_v2  ;;  %v422_v19 = vsub.f32 0.0, %v406_v0  ;;  %v353_v20 = vsub.f32 0.0, %v252_v3  ;;  %v408_v24 = vand.u32 2147483647, %v1285_v6 }
 0x113   :  { %v477_v1 = vadd.f32 1.0, %v1265_v46  ;;  %v1297_v17 = vpop.eup %904  ;;  %vm346_vm14 = vcmp.eq.s32.totalorder %v326_v7, %v1168_v63  ;;  %v1306_v25 = vadd.s32 32, %v1219_v2  ;;  %v447_v27 = vmul.f32 1.442695, %v421_v4 }
 0x114   :  { %v423_v28 = vsub.f32 0.0, %v407_v8  ;;  %v1311_v30 = vadd.s32 96, %v1219_v2  ;;  %v1313_v32 = vsel %vm346_vm14, %v261_v55, %v362_v9  ;;  %v486_v37 = vadd.f32 1.0, %v1297_v17 }
 0x115   :  { %918 = vlog2.f32 %v477_v1  ;;  %1754 = vst [vmem:[#allocation11_spill] sm:$0xff] %v1313_v32  ;;  %v1317_v38 = vadd.s32 56, %v1219_v2  ;;  %v1320_v41 = vadd.s32 48, %v1219_v2  ;;  %v1323_v45 = vadd.s32 120, %v1219_v2 }
 0x116   :  { %920 = vpow2.f32 %v441_v5  ;;  %v1308_v26 = vpop.eup %906  ;;  %v449_v48 = vmul.f32 1.442695, %v422_v19  ;;  %vm345_vm15 = vcmp.eq.s32.totalorder %v1301_v21, %v1168_v63  ;;  %v1331_v50 = vsel %vm337_vm13, %v252_v3, %v353_v20 }
 0x117   :  { %1755 = vst [vmem:[#allocation12_spill] sm:$0xff] %v1323_v45  ;;  %v1334_v51 = vadd.s32 112, %v1219_v2  ;;  %v424_v53 = vsub.f32 0.0, %v408_v24  ;;  %v495_v54 = vadd.f32 1.0, %v1308_v26  ;;  %v410_v55 = vand.u32 2147483647, %v1313_v32 }
 0x118   :  { %v401_v58 = vand.u32 2147483647, %v1331_v50  ;;  %922 = vpow2.f32 %v447_v27  ;;  %v451_v1 = vmul.f32 1.442695, %v423_v28  ;;  %v242_v4 = vmul.f32 %v1153_v52, %v217_v44 }
 0x119   :  { %924 = vlog2.f32 %v486_v37  ;;  %v462_v8 = vmul.f32 -0.5, %v1256_v40  ;;  %v453_v24 = vmul.f32 1.442695, %v424_v53  ;;  %v426_v52 = vsub.f32 0.0, %v410_v55 }
 0x11a   :  { %v417_v5 = vsub.f32 0.0, %v401_v58  ;;  %v1343_v7 = vpop.eup %908  ;;  %926 = vpow2.f32 %v449_v48  ;;  %v260_v19 = vadd.f32 %v1159_v56, %v242_v4  ;;  %v471_v37 = vmul.f32 -0.5, %v1248_v33 }
 0x11b   :  { %v1348_v20 = vpop.eup %910  ;;  %928 = vlog2.f32 %v495_v54  ;;  %v480_v48 = vmul.f32 -0.5, %v1265_v46  ;;  %v504_v56 = vadd.f32 1.0, %v1343_v7  ;;  %v463_v54 = vadd.f32 1.0, %v462_v8 }
 0x11c   :  { %v439_v27 = vmul.f32 1.442695, %v417_v5  ;;  %v1350_v28 = vpop.eup %912  ;;  %930 = vpow2.f32 %v451_v1  ;;  %v361_v4 = vsub.f32 0.0, %v260_v19  ;;  %vm666_vm0 = vcmp.lt.s32.totalorder %v1219_v2, %v1240_v23 }
 0x11d   :  { %v915_v0 = vpop.eup %914  ;;  %v474_v1 = vand.u32 2147483647, %v1248_v33  ;;  %vm667_vm1 = vcmp.lt.s32.totalorder %v1231_v18, %v1240_v23  ;;  %vm1367_vm2 = vcmp.lt.s32.totalorder %v1235_v22, %v1240_v23  ;;  %v457_v8 = vmul.f32 1.442695, %v426_v52 }
 0x11e   :  { %932 = vpow2.f32 %v439_v27  ;;  %v917_v53 = vpop.eup %916  ;;  %v1374_v55 = vsel %vm345_vm15, %v260_v19, %v361_v4  ;;  %v472_v44 = vadd.f32 1.0, %v471_v37  ;;  %v540_v9 = vadd.f32 1.0, %v1348_v20  ;;  %vm1430_vm9 = vmand %vm666_vm0, %vm1367_vm2 }
 0x11f   :  { %934 = vpow2.f32 %v453_v24  ;;  %1758 = vst [vmem:[#allocation13_spill] sm:$0xff] %v1374_v55  ;;  %v465_v58 = vand.u32 2147483647, %v1256_v40  ;;  %vm668_vm3 = vcmp.lt.s32.totalorder %v1277_v60, %v1240_v23  ;;  %v409_v22 = vand.u32 2147483647, %v1374_v55  ;;  %vm1444_vm10 = vmand %vm667_vm1, %vm1367_vm2 }
 0x120   :  { %v461_v47 = vmul.f32 0.6931472, %v917_v53  ;;  %v531_v24 = vadd.f32 1.0, %v1350_v28  ;;  %v481_v52 = vadd.f32 1.0, %v480_v48  ;;  %936 = vlog2.f32 %v504_v56  ;;  %vm1458_vm11 = vmand %vm668_vm3, %vm1367_vm2 }
 0x121   :  { %v464_v63 = vmul.f32 %v1256_v40, %v463_v54  ;;  %v489_v21 = vmul.f32 -0.5, %v1297_v17  ;;  %v483_v19 = vand.u32 2147483647, %v1265_v46  ;;  %v425_v37 = vsub.f32 0.0, %v409_v22 }
 0x122   :  { %v919_v3 = vpop.eup %918  ;;  %v470_v4 = vmul.f32 0.6931472, %v915_v0  ;;  %938 = vpow2.f32 %v457_v8  ;;  %v473_v32 = vmul.f32 %v1248_v33, %v472_v44  ;;  %v543_v53 = vmul.f32 -0.5, %v1348_v20 }
 0x123   :  { %v1376_v5 = vpop.eup %920  ;;  %v479_v36 = vmul.f32 0.6931472, %v919_v3  ;;  %vm1390_vm4 = vcmp.lt.f32.partialorder %v465_v58, 0.0004427343  ;;  %v455_v48 = vmul.f32 1.442695, %v425_v37  ;;  %940 = vlog2.f32 %v531_v24 }
 0x124   :  { %v522_v45 = vadd.f32 1.0, %v1376_v5  ;;  %v467_v56 = vsel %vm1390_vm4, %v464_v63, %v461_v47  ;;  %v482_v0 = vmul.f32 %v1265_v46, %v481_v52  ;;  %v498_v3 = vmul.f32 -0.5, %v1308_v26 }
 0x125   :  { %v1394_v40 = vpop.eup %922  ;;  %vm1400_vm5 = vcmp.lt.f32.partialorder %v474_v1, 0.0004427343  ;;  %v546_v44 = vand.u32 2147483647, %v1348_v20  ;;  %vm669_vm6 = vcmp.lt.s32.totalorder %v1259_v42, %v1240_v23  ;;  %vm1407_vm7 = vcmp.lt.f32.partialorder %v483_v19, 0.0004427343 }
 0x126   :  { %v925_v54 = vpop.eup %924  ;;  %942 = vpow2.f32 %v455_v48  ;;  %v476_v46 = vsel %vm1400_vm5, %v473_v32, %v470_v4  ;;  %v490_v55 = vadd.f32 1.0, %v489_v21  ;;  %v485_v1 = vsel %vm1407_vm7, %v482_v0, %v479_v36  ;;  %vm1504_vm15 = vmand %vm669_vm6, %vm1367_vm2 }
 0x127   :  { %v1411_v47 = vpop.eup %926  ;;  %944 = vlog2.f32 %v522_v45  ;;  %v1765_v22 = vmin.f32 %v1178_v12, 0.0  ;;  %v492_v52 = vand.u32 2147483647, %v1297_v17  ;;  %v549_v63 = vadd.f32 1.0, %v1394_v40 }
 0x128   :  { %v929_v8 = vpop.eup %928  ;;  %946 = vlog2.f32 %v540_v9  ;;  %vm670_vm8 = vcmp.lt.s32.totalorder %v1306_v25, %v1240_v23  ;;  %v544_v32 = vadd.f32 1.0, %v543_v53  ;;  %v534_v12 = vmul.f32 -0.5, %v1350_v28 }
 0x129   :  { %v603_v24 = vsub.f32 %v1765_v22, %v467_v56  ;;  %v1423_v19 = vpop.eup %930  ;;  %v488_v36 = vmul.f32 0.6931472, %v925_v54  ;;  %v499_v9 = vadd.f32 1.0, %v498_v3  ;;  %v1768_v37 = vmin.f32 %v1175_v10, 0.0  ;;  %vm1528_vm4 = vmand %vm670_vm8, %vm1367_vm2 }
 0x12a   :  { %v558_v53 = vadd.f32 1.0, %v1411_v47  ;;  %v1771_v48 = vmin.f32 %v1181_v15, 0.0  ;;  %v501_v0 = vand.u32 2147483647, %v1308_v26  ;;  %v491_v3 = vmul.f32 %v1297_v17, %v490_v55 }
 0x12b   :  { %v1435_v21 = vpop.eup %932  ;;  %v604_v4 = vsub.f32 %v1768_v37, %v476_v46  ;;  %v507_v18 = vmul.f32 -0.5, %v1343_v7  ;;  %v497_v54 = vmul.f32 0.6931472, %v929_v8  ;;  %v699_v58 = vsel %vm1430_vm9, %v603_v24, 0.0 }
 0x12c   :  { %v605_v56 = vsub.f32 %v1771_v48, %v485_v1  ;;  %v513_v33 = vadd.f32 1.0, %v1435_v21  ;;  %v1464_v15 = vpop.eup %934  ;;  %v537_v17 = vand.u32 2147483647, %v1350_v28  ;;  %vm1469_vm12 = vcmp.lt.f32.partialorder %v492_v52, 0.0004427343 }
 0x12d   :  { %948 = vlog2.f32 %v549_v63  ;;  %v494_v60 = vsel %vm1469_vm12, %v491_v3, %v488_v36  ;;  %v500_v55 = vmul.f32 %v1308_v26, %v499_v9  ;;  %v567_v1 = vadd.f32 1.0, %v1423_v19  ;;  %v937_v8 = vpop.eup %936 }
 0x12e   :  { %950 = vlog2.f32 %v513_v33  ;;  %v700_v22 = vsel %vm1444_vm10, %v604_v4, 0.0  ;;  %v701_v24 = vsel %vm1458_vm11, %v605_v56, 0.0  ;;  %vm671_vm13 = vcmp.lt.s32.totalorder %v1292_v13, %v1240_v23 }
 0x12f   :  { %952 = vlog2.f32 %v558_v53  ;;  %vm1483_vm14 = vcmp.lt.f32.partialorder %v501_v0, 0.0004427343  ;;  %v716_v63 = vadd.f32 %v700_v22, %v699_v58  ;;  %v508_v26 = vadd.f32 1.0, %v507_v18  ;;  %v1490_v9 = vpop.eup %938  ;;  %vm1575_vm10 = vmand %vm671_vm13, %vm1367_vm2 }
 0x130   :  { %v576_v45 = vadd.f32 1.0, %v1464_v15  ;;  %v503_v36 = vsel %vm1483_vm14, %v500_v55, %v497_v54  ;;  %v1493_v37 = vmul.f32 %v1348_v20, %v544_v32  ;;  %v1778_v4 = vmin.f32 %v1191_v31, 0.0  ;;  %v941_v31 = vpop.eup %940 }
 0x131   :  { %v561_v53 = vmul.f32 -0.5, %v1411_v47  ;;  %v510_v48 = vand.u32 2147483647, %v1343_v7  ;;  %v717_v0 = vadd.f32 %v716_v63, %v701_v24  ;;  %v506_v3 = vmul.f32 0.6931472, %v937_v8 }
 0x132   :  { %v606_v2 = vsub.f32 %v1778_v4, %v494_v60  ;;  %954 = vlog2.f32 %v567_v1  ;;  %v525_v32 = vmul.f32 -0.5, %v1376_v5  ;;  %v535_v10 = vadd.f32 1.0, %v534_v12 }
 0x133   :  { %vm1509_vm0 = vcmp.lt.f32.partialorder %v537_v17, 0.0004427343  ;;  %v564_v54 = vand.u32 2147483647, %v1411_v47  ;;  %v1783_v33 = vmin.f32 %v1199_v39, 0.0  ;;  %vm672_vm1 = vcmp.lt.s32.totalorder %v1320_v41, %v1240_v23  ;;  %v1518_v58 = vpop.eup %942 }
 0x134   :  { %vm674_vm3 = vcmp.lt.s32.totalorder %v1254_v35, %v1240_v23  ;;  %v509_v46 = vmul.f32 %v1343_v7, %v508_v26  ;;  %956 = vlog2.f32 %v576_v45  ;;  %v594_v39 = vadd.f32 1.0, %v1490_v9  ;;  %v945_v60 = vpop.eup %944 }
 0x135   :  { %v607_v42 = vsub.f32 %v1783_v33, %v503_v36  ;;  %v516_v17 = vmul.f32 -0.5, %v1435_v21  ;;  %vm1536_vm5 = vcmp.lt.f32.partialorder %v546_v44, 0.0004427343  ;;  %v702_v7 = vsel %vm1504_vm15, %v606_v2, 0.0  ;;  %v947_v22 = vpop.eup %946  ;;  %vm1607_vm15 = vmand %vm672_vm1, %vm1367_vm2 }
 0x136   :  { %v562_v1 = vadd.f32 1.0, %v561_v53  ;;  %vm1542_vm6 = vcmp.lt.f32.partialorder %v510_v48, 0.0004427343  ;;  %vm673_vm7 = vcmp.lt.s32.totalorder %v1317_v38, %v1240_v23  ;;  %v585_v8 = vadd.f32 1.0, %v1518_v58 }
 0x137   :  { %v552_v20 = vmul.f32 -0.5, %v1394_v40  ;;  %v512_v44 = vsel %vm1542_vm6, %v509_v46, %v506_v3  ;;  %v718_v24 = vadd.f32 %v717_v0, %v702_v7  ;;  %v526_v52 = vadd.f32 1.0, %v525_v32 }
 0x138   :  { %v533_v63 = vmul.f32 0.6931472, %v941_v31  ;;  %v703_v26 = vsel %vm1528_vm4, %v607_v42, 0.0  ;;  %v528_v45 = vand.u32 2147483647, %v1376_v5  ;;  %958 = vlog2.f32 %v585_v8 }
 0x139   :  { %v536_v36 = vmul.f32 %v1350_v28, %v535_v10  ;;  %v524_v4 = vmul.f32 0.6931472, %v945_v60  ;;  %960 = vlog2.f32 %v594_v39  ;;  %v517_v2 = vadd.f32 1.0, %v516_v17 }
 0x13a   :  { %vm675_vm8 = vcmp.lt.s32.totalorder %v1251_v34, %v1240_v23  ;;  %v1559_v53 = vmul.f32 %v1411_v47, %v562_v1  ;;  %v1790_v48 = vmin.f32 %v1208_v57, 0.0  ;;  %v391_v0 = vmin.f32 %v1279_v61, 0.0  ;;  %v949_v32 = vpop.eup %948 }
 0x13b   :  { %v519_v3 = vand.u32 2147483647, %v1435_v21  ;;  %v542_v31 = vmul.f32 0.6931472, %v947_v22  ;;  %vm1565_vm9 = vcmp.lt.f32.partialorder %v564_v54, 0.0004427343  ;;  %v719_v47 = vadd.f32 %v718_v24, %v703_v26  ;;  %v951_v42 = vpop.eup %950  ;;  %vm1662_vm6 = vmand %vm675_vm8, %vm1367_vm2 }
 0x13c   :  { %v608_v56 = vsub.f32 %v1790_v48, %v512_v44  ;;  %v555_v10 = vand.u32 2147483647, %v1394_v40  ;;  %v527_v33 = vmul.f32 %v1376_v5, %v526_v52  ;;  %v539_v54 = vsel %vm1509_vm0, %v536_v36, %v533_v63  ;;  %v953_v13 = vpop.eup %952  ;;  %vm1618_vm0 = vmand %vm674_vm3, %vm1367_vm2 }
 0x13d   :  { %v553_v46 = vadd.f32 1.0, %v552_v20  ;;  %vm676_vm11 = vcmp.lt.s32.totalorder %v1289_v11, %v1240_v23  ;;  %v386_v12 = vmin.f32 %v1228_v16, 0.0  ;;  %vm1585_vm12 = vcmp.lt.f32.partialorder %v528_v45, 0.0004427343  ;;  %vm1634_vm3 = vmand %vm673_vm7, %vm1367_vm2 }
 0x13e   :  { %v570_v17 = vmul.f32 -0.5, %v1423_v19  ;;  %v530_v5 = vsel %vm1585_vm12, %v527_v33, %v524_v4  ;;  %v515_v60 = vmul.f32 0.6931472, %v951_v42  ;;  %v518_v18 = vmul.f32 %v1435_v21, %v517_v2  ;;  %vm1680_vm8 = vmand %vm676_vm11, %vm1367_vm2 }
 0x13f   :  { %vm677_vm13 = vcmp.lt.s32.totalorder %v1262_v43, %v1240_v23  ;;  %v704_v7 = vsel %vm1575_vm10, %v608_v56, 0.0  ;;  %v579_v16 = vmul.f32 -0.5, %v1464_v15  ;;  %v385_v1 = vmin.f32 %v1331_v50, 0.0  ;;  %v955_v44 = vpop.eup %954 }
 0x140   :  { %vm520_vm14 = vcmp.lt.f32.partialorder %v519_v3, 0.0004427343  ;;  %v548_v25 = vsel %vm1536_vm5, %v1493_v37, %v542_v31  ;;  %v551_v8 = vmul.f32 0.6931472, %v949_v32  ;;  %v720_v20 = vadd.f32 %v719_v47, %v704_v7  ;;  %vm1700_vm10 = vmand %vm677_vm13, %vm1367_vm2 }
 0x141   :  { %v521_v22 = vsel %vm520_vm14, %v518_v18, %v515_v60  ;;  %v1799_v50 = vmin.f32 %v1216_v62, 0.0  ;;  %v560_v55 = vmul.f32 0.6931472, %v953_v13  ;;  %vm678_vm1 = vcmp.lt.s32.totalorder %v1311_v30, %v1240_v23  ;;  %v957_v36 = vpop.eup %956 }
 0x142   :  { %v610_v41 = vsub.f32 %v386_v12, %v530_v5  ;;  %v609_v52 = vsub.f32 %v385_v1, %v521_v22  ;;  %v554_v63 = vmul.f32 %v1394_v40, %v553_v46  ;;  %vm1625_vm4 = vcmp.lt.f32.partialorder %v555_v10, 0.0004427343  ;;  %vm1717_vm12 = vmand %vm678_vm1, %vm1367_vm2 }
 0x143   :  { %v611_v24 = vsub.f32 %v1799_v50, %v539_v54  ;;  %v571_v26 = vadd.f32 1.0, %v570_v17  ;;  %v588_v45 = vmul.f32 -0.5, %v1518_v58  ;;  %v1806_v4 = vmin.f32 %v1213_v59, 0.0 }
 0x144   :  { %v580_v2 = vadd.f32 1.0, %v579_v16  ;;  %vm679_vm5 = vcmp.lt.s32.totalorder %v1295_v14, %v1240_v23  ;;  %v573_v48 = vand.u32 2147483647, %v1423_v19  ;;  %v705_v56 = vsel %vm1607_vm15, %v609_v52, 0.0 }
 0x145   :  { %v612_v40 = vsub.f32 %v1806_v4, %v548_v25  ;;  %v557_v38 = vsel %vm1625_vm4, %v554_v63, %v551_v8  ;;  %v569_v3 = vmul.f32 0.6931472, %v955_v44  ;;  %v597_v32 = vmul.f32 -0.5, %v1490_v9  ;;  %v959_v33 = vpop.eup %958  ;;  %vm696_vm15 = vmand %vm679_vm5, %vm1367_vm2 }
 0x146   :  { %v721_v31 = vadd.f32 %v720_v20, %v705_v56  ;;  %v707_v59 = vsel %vm1618_vm0, %v611_v24, 0.0  ;;  %v566_v10 = vsel %vm1565_vm9, %v1559_v53, %v560_v55  ;;  %v582_v57 = vand.u32 2147483647, %v1464_v15  ;;  %v961_v12 = vpop.eup %960  ;;  %v1821_v55 = vld [vmem:[#allocation13_spill] sm:$0xff] }
 0x147   :  { %v706_v47 = vsel %vm1634_vm3, %v610_v41, 0.0  ;;  %v578_v54 = vmul.f32 0.6931472, %v957_v36  ;;  %v572_v46 = vmul.f32 %v1423_v19, %v571_v26  ;;  %v589_v53 = vadd.f32 1.0, %v588_v45  ;;  %v1823_v26 = vld [vmem:[#allocation12_spill] sm:$0xff] }
 0x148   :  { %v722_v28 = vadd.f32 %v721_v31, %v706_v47  ;;  %v1809_v39 = vmin.f32 %v1244_v29, 0.0  ;;  %v581_v17 = vmul.f32 %v1464_v15, %v580_v2  ;;  %vm1670_vm7 = vcmp.lt.f32.partialorder %v573_v48, 0.0004427343 }
 0x149   :  { %v591_v34 = vand.u32 2147483647, %v1518_v58  ;;  %v575_v29 = vsel %vm1670_vm7, %v572_v46, %v569_v3  ;;  %v598_v60 = vadd.f32 1.0, %v597_v32  ;;  %v587_v18 = vmul.f32 0.6931472, %v959_v33 }
 0x14a   :  { %v613_v13 = vsub.f32 %v1809_v39, %v557_v38  ;;  %v723_v15 = vadd.f32 %v722_v28, %v707_v59  ;;  %v708_v7 = vsel %vm1662_vm6, %v612_v40, 0.0  ;;  %v1814_v16 = vmin.f32 %v1269_v49, 0.0 }
 0x14b   :  { %vm1690_vm9 = vcmp.lt.f32.partialorder %v582_v57, 0.0004427343  ;;  %v600_v11 = vand.u32 2147483647, %v1490_v9  ;;  %v596_v49 = vmul.f32 0.6931472, %v961_v12  ;;  %v590_v20 = vmul.f32 %v1518_v58, %v589_v53 }
 0x14c   :  { %v614_v1 = vsub.f32 %v1814_v16, %v566_v10  ;;  %v584_v22 = vsel %vm1690_vm9, %v581_v17, %v578_v54  ;;  %v724_v21 = vadd.f32 %v723_v15, %v708_v7  ;;  %v709_v44 = vsel %vm1680_vm8, %v613_v13, 0.0 }
 0x14d   :  { %v392_v50 = vmin.f32 %v1285_v6, 0.0  ;;  %v615_v24 = vsub.f32 %v391_v0, %v575_v29  ;;  %vm592_vm11 = vcmp.lt.f32.partialorder %v591_v34, 0.0004427343  ;;  %v599_v58 = vmul.f32 %v1490_v9, %v598_v60 }
 0x14e   :  { %v593_v37 = vsel %vm592_vm11, %v590_v20, %v587_v18  ;;  %vm680_vm13 = vcmp.lt.s32.totalorder %v1334_v51, %v1240_v23  ;;  %v725_v6 = vadd.f32 %v724_v21, %v709_v44  ;;  %v710_v61 = vsel %vm1700_vm10, %v614_v1, 0.0  ;;  %v1822_v51 = vld [vmem:[#allocation11_spill] sm:$0xff] }
 0x14f   :  { %v616_v0 = vsub.f32 %v392_v50, %v584_v22  ;;  %vm601_vm14 = vcmp.lt.f32.partialorder %v600_v11, 0.0004427343  ;;  %v393_v41 = vmin.f32 %v1821_v55, 0.0  ;;  %v711_v52 = vsel %vm1717_vm12, %v615_v24, 0.0  ;;  %vm697_vm1 = vmand %vm680_vm13, %vm1367_vm2 }
 0x150   :  { %v602_v30 = vsel %vm601_vm14, %v599_v58, %v596_v49  ;;  %v726_v9 = vadd.f32 %v725_v6, %v710_v61  ;;  %v394_v63 = vmin.f32 %v1822_v51, 0.0  ;;  %vm681_vm0 = vcmp.lt.s32.totalorder %v1823_v26, %v1240_v23 }
 0x151   :  { %v617_v62 = vsub.f32 %v393_v41, %v593_v37  ;;  %v712_v45 = vsel %vm696_vm15, %v616_v0, 0.0  ;;  %vm698_vm4 = vmand %vm681_vm0, %vm1367_vm2 }
 0x152   :  { %v727_v35 = vadd.f32 %v726_v9, %v711_v52  ;;  %v618_v36 = vsub.f32 %v394_v63, %v602_v30 }
 0x153   :  { %v713_v4 = vsel %vm697_vm1, %v617_v62, 0.0 }
 0x154   :  { %v728_v14 = vadd.f32 %v727_v35, %v712_v45  ;;  %v714_v2 = vsel %vm698_vm4, %v618_v36, 0.0 }
 0x156   :  { %v729_v40 = vadd.f32 %v728_v14, %v713_v4 }
 0x158   :  { %v730_v48 = vadd.f32 %v729_v40, %v714_v2 }
 0x15a   :  { %732 = vst [vmem:[#allocation8] sm:$0xff] %v730_v48 }
 0x15b   :  { %993 = shalt.err (!%p990_p9)
}
 0x15c   :  { %763 = dma.vmem_to_hbm [thread:$0]  %s761_s26, 128, %s1751_s7, [#allocation7]  }
 0x15d   :  { %1004 = dma.done.wait [#allocation7], 128  }
 0x15e   :  { %1005 = vsyncadd [#allocation7], 4294967168 }
 0x15f   :  { %767 = vsyncpa [#allocation6], 1 }
 0x160   :  { %768 = vsyncpa [#allocation7], 1 }

</bundles_post_ra>
